<compile_context>
chip_gen: v5e
topology: v5e:2x2
jax: 0.10.0
libtpu: 0.0.40
codegen_flags: <defaults>
</compile_context>

<pallas_src>
import functools
import math

import jax
import jax.numpy as jnp
from jax import lax
from jax.experimental import pallas as pl
from jax.experimental.pallas import tpu as pltpu

EPS = 1e-5
EXPANSION = 4
LANE = 128
TILE_CAP = 4096
TILE_FLOOR = 512
_TILE_BUDGET = 12 * 1024 * 1024    # per-step VMEM working-set target (bytes)
_VMEM_LIMIT = 40 * 1024 * 1024     # fits v5e/v6e (128 MiB) and v7x (64 MiB/TC)

_PAR_PARAMS = pltpu.CompilerParams(dimension_semantics=("parallel",),
                                   vmem_limit_bytes=_VMEM_LIMIT)


def _rup(x, m):
    return (x + m - 1) // m * m


def _pad_to(a, target_shape):
    pads = [(0, t - s) for s, t in zip(a.shape, target_shape)]
    if all(p == (0, 0) for p in pads):
        return a
    return jnp.pad(a, pads)


def _full_spec(shape):
    nd = len(shape)
    return pl.BlockSpec(shape, lambda i: (0,) * nd)


def _row_tile(m, k, c, has_norm=False):
    # Approximate VMEM bytes per row: double-buffered bf16 in/out tiles plus
    # the f32 in-kernel intermediates (matmul result, optional normalized x).
    per_row = 2 * 2 * (k + c) + 4 * c + (4 * k if has_norm else 0)
    cap = (_TILE_BUDGET // per_row) // 8 * 8
    cap = max(TILE_FLOOR, min(TILE_CAP, cap))
    return min(cap, _rup(m, 8))


def _stats_block(y):
    # Pack per-tile partial BN stats into a (16, C) slab: rows 0-7 = column
    # sum (broadcast), rows 8-15 = column sum-of-squares (broadcast).
    srow = jnp.sum(y, axis=0, keepdims=True)
    qrow = jnp.sum(y * y, axis=0, keepdims=True)
    rows = lax.broadcasted_iota(jnp.int32, (16, y.shape[-1]), 0)
    return jnp.where(rows < 8, srow, qrow)


def _stats_reduce(st):
    return (jnp.sum(st[:, 0, :], axis=0, keepdims=True),
            jnp.sum(st[:, 8, :], axis=0, keepdims=True))


def _bn_coeffs(col_sum, col_sq, count, gamma, beta):
    mean = col_sum / count
    var = jnp.maximum(col_sq / count - mean * mean, 0.0)
    scale = gamma * lax.rsqrt(var + EPS)
    shift = beta - mean * scale
    return scale, shift


# ----------------------------- Pallas kernels ------------------------------ #

def _mm_stats_kernel(*args, has_norm, tile_rows, valid_rows):
    # Optional prologue: normalize+ReLU the bf16 input tile (fused BN of the
    # previous stage); bf16 MXU matmul; bf16 store of y; per-tile partial
    # BN statistics written as a (1, 16, C) block.
    if has_norm:
        x_ref, sc_ref, sh_ref, w_ref, y_ref, st_ref = args
        xv = jnp.maximum(
            x_ref[...].astype(jnp.float32) * sc_ref[...] + sh_ref[...], 0.0)
        if valid_rows is not None:  # zero padded rows so stats stay exact
            rows = (pl.program_id(0) * tile_rows
                    + lax.broadcasted_iota(jnp.int32, xv.shape, 0))
            xv = jnp.where(rows < valid_rows, xv, 0.0)
        x = xv.astype(jnp.bfloat16)
    else:
        x_ref, w_ref, y_ref, st_ref = args
        x = x_ref[...]

    y = jnp.dot(x, w_ref[...], preferred_element_type=jnp.float32)
    y_ref[...] = y.astype(y_ref.dtype)
    st_ref[...] = _stats_block(y)[None]


def _conv3x3_fused_kernel(xp_ref, sc_ref, sh_ref, w_ref, y_ref, st_ref, *, h, w):
    # stride-1 3x3 conv over one image: fused BN1 normalize+ReLU prologue on
    # the raw zero-padded conv1 output (halo re-masked), 9 accumulating MXU
    # matmuls, bf16 store, per-image partial BN2 stats.
    x = xp_ref[0].astype(jnp.float32)                      # (h+2, w+2, C)
    xn = jnp.maximum(x * sc_ref[...] + sh_ref[...], 0.0)
    ri = lax.broadcasted_iota(jnp.int32, xn.shape, 0)
    ci = lax.broadcasted_iota(jnp.int32, xn.shape, 1)
    inside = (ri >= 1) & (ri <= h) & (ci >= 1) & (ci <= w)
    xn = jnp.where(inside, xn, 0.0).astype(jnp.bfloat16)   # zero halo again

    cp = xn.shape[-1]
    acc = None
    for di in range(3):
        for dj in range(3):
            tap = xn[di:di + h, dj:dj + w, :].reshape(h * w, cp)
            part = jnp.dot(tap, w_ref[di * 3 + dj],
                           preferred_element_type=jnp.float32)
            acc = part if acc is None else acc + part
    y_ref[...] = acc[None].astype(y_ref.dtype)
    st_ref[...] = _stats_block(acc)[None]


def _conv3x3_taps_kernel(*args, n_tap, w_out):
    # stride-2 3x3 conv as 9 accumulating MXU matmuls over host-built
    # even/odd W-subsampled row-tap blocks; partial BN2 stats epilogue.
    tap_refs = args[:n_tap]
    w_ref = args[n_tap]
    y_ref, st_ref = args[n_tap + 1:]

    acc = None
    for di in range(3):
        even = tap_refs[2 * di][...]
        odd = tap_refs[2 * di + 1][...]
        slices = [even[:, 0:w_out, :],
                  odd[:, 0:w_out, :],
                  even[:, 1:w_out + 1, :]]
        for dj, xs in enumerate(slices):
            xm = xs.reshape(xs.shape[0] * w_out, xs.shape[2])
            part = jnp.dot(xm, w_ref[di * 3 + dj],
                           preferred_element_type=jnp.float32)
            acc = part if acc is None else acc + part
    y_ref[...] = acc.astype(y_ref.dtype)
    st_ref[...] = _stats_block(acc)[None]


def _norm_relu_kernel(y_ref, sc_ref, sh_ref, o_ref):
    o_ref[...] = jnp.maximum(
        y_ref[...].astype(jnp.float32) * sc_ref[...] + sh_ref[...],
        0.0).astype(o_ref.dtype)


def _final_kernel(*args, has_proj, emit_pre):
    # bn3(conv3) + shortcut (bn(conv1x1) or identity) -> add, relu.
    if has_proj:
        y3_ref, sc3_ref, sh3_ref, ys_ref, scs_ref, shs_ref = args[:6]
        outs = args[6:]
        short = ys_ref[...].astype(jnp.float32) * scs_ref[...] + shs_ref[...]
    else:
        y3_ref, sc3_ref, sh3_ref, xs_ref = args[:4]
        outs = args[4:]
        short = xs_ref[...].astype(jnp.float32)
    pre = y3_ref[...].astype(jnp.float32) * sc3_ref[...] + sh3_ref[...] + short
    outs[0][...] = jnp.maximum(pre, 0.0)
    if emit_pre:
        outs[1][...] = pre


# ------------------------------ pallas_call glue ---------------------------- #

def _mm_stats(x2d, w, scale=None, shift=None):
    m, k = x2d.shape
    c = w.shape[1]
    has_norm = scale is not None
    tile = _row_tile(m, k, c, has_norm)
    mp = _rup(m, tile)
    x2d = _pad_to(x2d, (mp, k))
    valid = m if (has_norm and mp != m) else None
    nt = mp // tile

    args = [x2d]
    in_specs = [pl.BlockSpec((tile, k), lambda i: (i, 0))]
    if has_norm:
        args += [scale, shift]
        in_specs += [_full_spec((1, k)), _full_spec((1, k))]
    args.append(w)
    in_specs.append(_full_spec((k, c)))

    return pl.pallas_call(
        functools.partial(_mm_stats_kernel, has_norm=has_norm,
                          tile_rows=tile, valid_rows=valid),
        out_shape=(jax.ShapeDtypeStruct((mp, c), jnp.bfloat16),
                   jax.ShapeDtypeStruct((nt, 16, c), jnp.float32)),
        grid=(nt,),
        in_specs=in_specs,
        out_specs=(pl.BlockSpec((tile, c), lambda i: (i, 0)),
                   pl.BlockSpec((1, 16, c), lambda i: (i, 0, 0))),
        compiler_params=_PAR_PARAMS,
    )(*args)


def _conv3x3_fused(y1_4d, sc1, sh1, w2, h, w):
    # stride-1 path: one grid step per image, whole padded image as the block.
    n, _, _, cp = y1_4d.shape
    xp = jnp.pad(y1_4d, ((0, 0), (1, 1), (1, 1), (0, 0)))
    hw = h * w
    return pl.pallas_call(
        functools.partial(_conv3x3_fused_kernel, h=h, w=w),
        out_shape=(jax.ShapeDtypeStruct((n, hw, cp), jnp.bfloat16),
                   jax.ShapeDtypeStruct((n, 16, cp), jnp.float32)),
        grid=(n,),
        in_specs=[pl.BlockSpec((1, h + 2, w + 2, cp), lambda i: (i, 0, 0, 0)),
                  _full_spec((1, cp)), _full_spec((1, cp)),
                  _full_spec((9, cp, cp))],
        out_specs=(pl.BlockSpec((1, hw, cp), lambda i: (i, 0, 0)),
                   pl.BlockSpec((1, 16, cp), lambda i: (i, 0, 0))),
        compiler_params=_PAR_PARAMS,
    )(xp, sc1, sh1, w2)


def _conv3x3_taps(h_nhwc, w2, h_out, w_out):
    # stride-2 path (kept from the previous version, bf16 out + partial stats).
    n, hh, ww, cp = h_nhwc.shape
    s = 2
    padded = jnp.pad(h_nhwc, ((0, 0), (1, 1), (1, 1), (0, 0)))
    nr = n * h_out

    taps = []
    for di in range(3):
        t = padded[:, di:di + (h_out - 1) * s + 1:s, :, :]
        t = t.reshape(nr, ww + 2, cp)
        taps.append(t[:, 0::2, :])   # even columns
        taps.append(t[:, 1::2, :])   # odd columns

    step = 8 // math.gcd(w_out, 8)           # make tr*w_out a multiple of 8
    rows_cap = _row_tile(nr * w_out, 3 * cp, cp)
    tr = max(1, min(nr, rows_cap // w_out))
    tr = max(step, tr // step * step)
    nrp = _rup(nr, tr)
    nt = nrp // tr

    padded_taps, in_specs = [], []
    for t in taps:
        wt = _rup(t.shape[1], 8)
        padded_taps.append(_pad_to(t, (nrp, wt, cp)))
        in_specs.append(pl.BlockSpec((tr, wt, cp), lambda i: (i, 0, 0)))
    in_specs.append(_full_spec(w2.shape))

    mp = nrp * w_out
    return pl.pallas_call(
        functools.partial(_conv3x3_taps_kernel, n_tap=len(padded_taps),
                          w_out=w_out),
        out_shape=(jax.ShapeDtypeStruct((mp, cp), jnp.bfloat16),
                   jax.ShapeDtypeStruct((nt, 16, cp), jnp.float32)),
        grid=(nt,),
        in_specs=in_specs,
        out_specs=(pl.BlockSpec((tr * w_out, cp), lambda i: (i, 0)),
                   pl.BlockSpec((1, 16, cp), lambda i: (i, 0, 0))),
        compiler_params=_PAR_PARAMS,
    )(*padded_taps, w2)


def _norm_relu(y, scale, shift, out_dtype=jnp.bfloat16):
    m, c = y.shape
    tile = _row_tile(m, c, c)
    mp = _rup(m, tile)
    y = _pad_to(y, (mp, c))
    return pl.pallas_call(
        _norm_relu_kernel,
        out_shape=jax.ShapeDtypeStruct((mp, c), out_dtype),
        grid=(mp // tile,),
        in_specs=[pl.BlockSpec((tile, c), lambda i: (i, 0)),
                  _full_spec((1, c)), _full_spec((1, c))],
        out_specs=pl.BlockSpec((tile, c), lambda i: (i, 0)),
        compiler_params=_PAR_PARAMS,
    )(y, scale, shift)


def _final(y3, sc3, sh3, short2d, short_bn, emit_pre):
    m, c = y3.shape
    tile = _row_tile(m, c, c)
    mp = _rup(m, tile)
    y3 = _pad_to(y3, (mp, c))
    short2d = _pad_to(short2d, (mp, c))
    has_proj = short_bn is not None

    row_spec = pl.BlockSpec((tile, c), lambda i: (i, 0))
    args = [y3, sc3, sh3, short2d]
    in_specs = [row_spec, _full_spec((1, c)), _full_spec((1, c)), row_spec]
    if has_proj:
        scs, shs = short_bn
        args += [scs, shs]
        in_specs += [_full_spec((1, c)), _full_spec((1, c))]

    if emit_pre:
        out_shape = (jax.ShapeDtypeStruct((mp, c), jnp.float32),
                     jax.ShapeDtypeStruct((mp, c), jnp.float32))
        out_specs = (row_spec, row_spec)
    else:
        out_shape = jax.ShapeDtypeStruct((mp, c), jnp.float32)
        out_specs = row_spec

    res = pl.pallas_call(
        functools.partial(_final_kernel, has_proj=has_proj, emit_pre=emit_pre),
        out_shape=out_shape,
        grid=(mp // tile,),
        in_specs=in_specs,
        out_specs=out_specs,
        compiler_params=_PAR_PARAMS,
    )(*args)
    if emit_pre:
        return res[0], res[1]
    return res, None


# ------------------------------ Bottleneck forward -------------------------- #

def bottleneck_forward(x_nchw, params, stride=1, is_last=False):
    n, cin, h, w = x_nchw.shape
    planes = params["w1"].shape[1]
    cout = EXPANSION * planes
    s = stride
    assert s in (1, 2)
    ho = (h + 2 - 3) // s + 1
    wo = (w + 2 - 3) // s + 1
    m0 = n * h * w
    m1 = n * ho * wo

    cin_p = _rup(cin, LANE)
    p_p = _rup(planes, LANE)
    cout_p = _rup(cout, LANE)

    x_nhwc = jnp.transpose(x_nchw, (0, 2, 3, 1)).astype(jnp.float32)
    x_padc = _pad_to(x_nhwc, (n, h, w, cin_p))

    # conv1 (1x1) + bn1 stats
    w1 = _pad_to(params["w1"], (cin_p, p_p)).astype(jnp.bfloat16)
    g1 = _pad_to(params["g1"], (1, p_p))
    b1 = _pad_to(params["b1"], (1, p_p))
    y1, st1 = _mm_stats(x_padc.reshape(m0, cin_p).astype(jnp.bfloat16), w1)
    s1, q1 = _stats_reduce(st1)
    sc1, sh1 = _bn_coeffs(s1, q1, m0, g1, b1)

    # conv2 (3x3, stride, pad=1) + bn2 stats
    w2 = _pad_to(params["w2"], (3, 3, p_p, p_p)).astype(jnp.bfloat16)
    w2 = w2.reshape(9, p_p, p_p)
    g2 = _pad_to(params["g2"], (1, p_p))
    b2 = _pad_to(params["b2"], (1, p_p))
    if s == 1:
        # fused path: BN1 normalize+ReLU runs inside the conv2 kernel
        y1_4d = y1[:m0].reshape(n, h, w, p_p)
        y2_img, st2 = _conv3x3_fused(y1_4d, sc1, sh1, w2, h, w)
        y2 = y2_img.reshape(m1, p_p)
    else:
        h1 = _norm_relu(y1, sc1, sh1)[:m0].reshape(n, h, w, p_p)
        y2_rows, st2 = _conv3x3_taps(h1, w2, ho, wo)
        y2 = y2_rows[:m1]
    s2, q2 = _stats_reduce(st2)
    sc2, sh2 = _bn_coeffs(s2, q2, m1, g2, b2)

    # conv3 (1x1): bn2 normalize + ReLU fused as prologue; bn3 stats
    w3 = _pad_to(params["w3"], (p_p, cout_p)).astype(jnp.bfloat16)
    g3 = _pad_to(params["g3"], (1, cout_p))
    b3 = _pad_to(params["b3"], (1, cout_p))
    y3, st3 = _mm_stats(y2, w3, scale=sc2, shift=sh2)
    s3, q3 = _stats_reduce(st3)
    sc3, sh3 = _bn_coeffs(s3, q3, m1, g3, b3)

    # shortcut (projection conv+bn, or identity), final fused add + relu
    xs = x_padc[:, 0:(ho - 1) * s + 1:s, 0:(wo - 1) * s + 1:s, :]
    if "ws" in params:
        ws = _pad_to(params["ws"], (cin_p, cout_p)).astype(jnp.bfloat16)
        gs = _pad_to(params["gs"], (1, cout_p))
        bs = _pad_to(params["bs"], (1, cout_p))
        ys, sts = _mm_stats(xs.reshape(m1, cin_p).astype(jnp.bfloat16), ws)
        ss, qs = _stats_reduce(sts)
        scs, shs = _bn_coeffs(ss, qs, m1, gs, bs)
        out2d, pre2d = _final(y3[:m1], sc3, sh3, ys[:m1], (scs, shs), is_last)
    else:
        assert cin_p == cout_p, (
            "identity shortcut requires in_planes == expansion * planes")
        out2d, pre2d = _final(y3[:m1], sc3, sh3,
                              xs.reshape(m1, cout_p), None, is_last)

    def to_nchw(a2d):
        return jnp.transpose(a2d[:m1, :cout].reshape(n, ho, wo, cout),
                             (0, 3, 1, 2))

    out = to_nchw(out2d)
    if is_last:
        return out, to_nchw(pre2d)
    return out


# ------------------------------ params & reference -------------------------- #

def init_params(key, in_planes, planes, stride):
    ks = jax.random.split(key, 12)
    f = lambda k, shape: 0.1 * jax.random.normal(k, shape, jnp.float32)
    p = dict(
        w1=f(ks[0], (in_planes, planes)),
        g1=1.0 + f(ks[1], (1, planes)), b1=f(ks[2], (1, planes)),
        w2=f(ks[3], (3, 3, planes, planes)),
        g2=1.0 + f(ks[4], (1, planes)), b2=f(ks[5], (1, planes)),
        w3=f(ks[6], (planes, EXPANSION * planes)),
        g3=1.0 + f(ks[7], (1, EXPANSION * planes)),
        b3=f(ks[8], (1, EXPANSION * planes)),
    )
    if stride != 1 or in_planes != EXPANSION * planes:
        p["ws"] = f(ks[9], (in_planes, EXPANSION * planes))
        p["gs"] = 1.0 + f(ks[10], (1, EXPANSION * planes))
        p["bs"] = f(ks[11], (1, EXPANSION * planes))
    return p


def ref_forward(x_nchw, params, stride=1, is_last=False):
    # Pure-JAX reference mirroring the PyTorch forward (train-mode BN).
    def conv(x, w_oihw, s, pad):
        return lax.conv_general_dilated(
            x, w_oihw, (s, s), pad, dimension_numbers=("NCHW", "OIHW", "NCHW"))

    def bn(y, g, b):
        mean = jnp.mean(y, axis=(0, 2, 3), keepdims=True)
        var = jnp.mean(jnp.square(y - mean), axis=(0, 2, 3), keepdims=True)
        return ((y - mean) * lax.rsqrt(var + EPS) * g.reshape(1, -1, 1, 1)
                + b.reshape(1, -1, 1, 1))

    w1 = jnp.transpose(params["w1"])[:, :, None, None]
    w2 = jnp.transpose(params["w2"], (3, 2, 0, 1))
    w3 = jnp.transpose(params["w3"])[:, :, None, None]
    out = jax.nn.relu(bn(conv(x_nchw, w1, 1, [(0, 0), (0, 0)]),
                         params["g1"], params["b1"]))
    out = jax.nn.relu(bn(conv(out, w2, stride, [(1, 1), (1, 1)]),
                         params["g2"], params["b2"]))
    out = bn(conv(out, w3, 1, [(0, 0), (0, 0)]), params["g3"], params["b3"])
    if "ws" in params:
        ws = jnp.transpose(params["ws"])[:, :, None, None]
        short = bn(conv(x_nchw, ws, stride, [(0, 0), (0, 0)]),
                   params["gs"], params["bs"])
    else:
        short = x_nchw
    preact = out + short
    out = jax.nn.relu(preact)
    return (out, preact) if is_last else out


if __name__ == "__main__":
    key = jax.random.PRNGKey(0)
    kx, kp, kx2, kp2 = jax.random.split(key, 4)

    # Case 1: projection shortcut (stride=2), is_last=True
    n, cin, h, w = 2, 8, 16, 16
    planes, stride = 4, 2
    x = jax.random.normal(kx, (n, cin, h, w), jnp.float32)
    params = init_params(kp, cin, planes, stride)
    out, pre = bottleneck_forward(x, params, stride=stride, is_last=True)
    out, pre = jax.block_until_ready((out, pre))
    assert out.shape == (n, EXPANSION * planes, h // stride, w // stride)
    assert pre.shape == out.shape
    ref_out, ref_pre = ref_forward(x, params, stride=stride, is_last=True)
    ok1 = (jnp.allclose(out, ref_out, atol=5e-2, rtol=5e-2)
           and jnp.allclose(pre, ref_pre, atol=5e-2, rtol=5e-2))

    # Case 2: identity shortcut (stride=1, in_planes == 4*planes), is_last=False
    cin2, planes2, stride2 = 16, 4, 1
    x2 = jax.random.normal(kx2, (n, cin2, h, w), jnp.float32)
    params2 = init_params(kp2, cin2, planes2, stride2)
    out2 = bottleneck_forward(x2, params2, stride=stride2, is_last=False)
    out2 = jax.block_until_ready(out2)
    assert out2.shape == (n, EXPANSION * planes2, h, w)
    ref_out2 = ref_forward(x2, params2, stride=stride2, is_last=False)
    ok2 = jnp.allclose(out2, ref_out2, atol=5e-2, rtol=5e-2)

    if not (bool(ok1) and bool(ok2)):
        raise AssertionError("Pallas Bottleneck does not match JAX reference")
    print("KERNEL_OK")
</pallas_src>

<mosaic_0001>
module attributes {stable_mosaic.version = 11 : i64} {
  func.func @_mm_stats_kernel(%arg0: i32, %arg1: memref<512x128xbf16, #tpu.memory_space<vmem>>, %arg2: memref<128x128xbf16, #tpu.memory_space<vmem>>, %arg3: memref<512x128xbf16, #tpu.memory_space<vmem>>, %arg4: memref<1x16x128xf32, #tpu.memory_space<vmem>>) attributes {dimension_semantics = [#tpu.dimension_semantics<parallel>], iteration_bounds = array<i64: 1>, scalar_prefetch = 0 : i64, scratch_operands = 0 : i64, tpu.core_type = #tpu.core_type<tc>, window_params = [{transform_indices = @transform_0, window_bounds = array<i64: 512, 128>}, {pipeline_mode = #tpu.pipeline_mode<synchronous>, transform_indices = @transform_1, window_bounds = array<i64: 128, 128>}, {transform_indices = @transform_2, window_bounds = array<i64: 512, 128>}, {transform_indices = @transform_3, window_bounds = array<i64: 1, 16, 128>}]} {
    %c0 = arith.constant 0 : index
    %c0_0 = arith.constant 0 : index
    %0 = vector.load %arg1[%c0, %c0_0] : memref<512x128xbf16, #tpu.memory_space<vmem>>, vector<512x128xbf16>
    %c0_1 = arith.constant 0 : index
    %c0_2 = arith.constant 0 : index
    %1 = vector.load %arg2[%c0_1, %c0_2] : memref<128x128xbf16, #tpu.memory_space<vmem>>, vector<128x128xbf16>
    %cst = arith.constant dense<0.000000e+00> : vector<512x128xf32>
    %2 = tpu.matmul %0, %1, %cst {dimension_numbers = #tpu.dot_dimension_numbers<[1], [0], [0], [1], [0, 0, 1, 1], [], []>} : vector<512x128xbf16>, vector<128x128xbf16>, vector<512x128xf32> -> vector<512x128xf32>
    %3 = arith.truncf %2 : vector<512x128xf32> to vector<512x128xbf16>
    %c0_3 = arith.constant 0 : index
    %c0_4 = arith.constant 0 : index
    %4 = vector.load %arg3[%c0_3, %c0_4] : memref<512x128xbf16, #tpu.memory_space<vmem>>, vector<512x128xbf16>
    tpu.vector_store %arg3[%c0_3, %c0_4], %3 {strides = array<i32>} : memref<512x128xbf16, #tpu.memory_space<vmem>>, vector<512x128xbf16>,
    %cst_5 = arith.constant dense<0.000000e+00> : vector<128xf32>
    %5 = vector.multi_reduction <add>, %2, %cst_5 [0] : vector<512x128xf32> to vector<128xf32>
    %6 = vector.shape_cast %5 : vector<128xf32> to vector<1x128xf32>
    %7 = arith.mulf %2, %2 : vector<512x128xf32>
    %cst_6 = arith.constant dense<0.000000e+00> : vector<128xf32>
    %8 = vector.multi_reduction <add>, %7, %cst_6 [0] : vector<512x128xf32> to vector<128xf32>
    %9 = vector.shape_cast %8 : vector<128xf32> to vector<1x128xf32>
    %10 = tpu.iota {dimensions = array<i32: 0>} : vector<16x128xi32>
    %c8_i32 = arith.constant 8 : i32
    %11 = vector.broadcast %c8_i32 : i32 to vector<16x128xi32>
    %12 = arith.cmpi slt, %10, %11 : vector<16x128xi32>
    %13 = vector.shape_cast %6 : vector<1x128xf32> to vector<1x128xf32>
    %14 = vector.broadcast %13 : vector<1x128xf32> to vector<16x128xf32>
    %15 = vector.shape_cast %9 : vector<1x128xf32> to vector<1x128xf32>
    %16 = vector.broadcast %15 : vector<1x128xf32> to vector<16x128xf32>
    %17 = arith.select %12, %14, %16 : vector<16x128xi1>, vector<16x128xf32>
    %18 = vector.shape_cast %17 : vector<16x128xf32> to vector<1x16x128xf32>
    %c0_7 = arith.constant 0 : index
    %c0_8 = arith.constant 0 : index
    %c0_9 = arith.constant 0 : index
    %19 = vector.load %arg4[%c0_7, %c0_8, %c0_9] : memref<1x16x128xf32, #tpu.memory_space<vmem>>, vector<1x16x128xf32>
    tpu.vector_store %arg4[%c0_7, %c0_8, %c0_9], %18 {strides = array<i32>} : memref<1x16x128xf32, #tpu.memory_space<vmem>>, vector<1x16x128xf32>,
    return
  }
  func.func @transform_0(%arg0: i32) -> (i32, i32) {
    %c0_i32 = arith.constant 0 : i32
    %c0_i32_0 = arith.constant 0 : i32
    return %arg0, %c0_i32 : i32, i32
  }
  func.func @transform_1(%arg0: i32) -> (i32, i32) {
    %c0_i32 = arith.constant 0 : i32
    %c0_i32_0 = arith.constant 0 : i32
    %c0_i32_1 = arith.constant 0 : i32
    return %c0_i32, %c0_i32_0 : i32, i32
  }
  func.func @transform_2(%arg0: i32) -> (i32, i32) {
    %c0_i32 = arith.constant 0 : i32
    %c0_i32_0 = arith.constant 0 : i32
    return %arg0, %c0_i32 : i32, i32
  }
  func.func @transform_3(%arg0: i32) -> (i32, i32, i32) {
    %c0_i32 = arith.constant 0 : i32
    %c0_i32_0 = arith.constant 0 : i32
    %c0_i32_1 = arith.constant 0 : i32
    return %arg0, %c0_i32, %c0_i32_0 : i32, i32, i32
  }
}

</mosaic_0001>

<bundles_post_ra>
// kernel: tpu_custom_call.1
= control target key start
LH: loop header
LB: loop body
LE: loop exit
PB: predicated region body
PF: predicated region fallthrough
CT: control target
= control target key end

     0   :  { %9 = vsyncpa [#allocation3], 0  ;;  %s1783_s0 = inlined_call_operand.hbm [shape: bf16[512,128], index: 0, kind: input, shape index: {}]   ;;  %s1784_s1 = inlined_call_operand.hbm [shape: bf16[128,128], index: 1, kind: input, shape index: {}]   ;;  %s1785_s2 = inlined_call_operand.hbm [shape: bf16[512,128], index: 2, kind: output, shape index: {0}]   ;;  %s1786_s3 = inlined_call_operand.hbm [shape: f32[1,16,128], index: 3, kind: output, shape index: {1}]  }
   0x1   :  { %10 = vsyncpa [#allocation6], 0 }
   0x2   :  { %11 = vsyncpa [#allocation4], 0 }
   0x3   :  { %12 = vsyncpa [#allocation9], 0  ;;  %s17_s14 = sshll.u32 %s1783_s0, 4  ;;  %s1440_s15 = smov [#allocation2]   ;;  %s18_s14 = int_to_ptr.hbm [resolvable:$true] %s17_s14 }
   0x4   :  { %s19_s16 = sshll.u32 %s1440_s15, 4  ;;  %s30_s19 = sshll.u32 %s1784_s1, 4  ;;  %s20_s16 = int_to_ptr.vmem [resolvable:$true] %s19_s16  ;;  %s31_s19 = int_to_ptr.hbm [resolvable:$true] %s30_s19 }
   0x5   :  { %s1441_s20 = smov 64   ;;  %s1442_s21 = smov 4  }
   0x6   :  { %25 = dma.hbm_to_vmem [thread:$0]  %s18_s14, 4096, %s20_s16, [#allocation3], %s1441_s20, %s1441_s20, %s1442_s21  }
   0x7   :  { %s1443_s22 = smov [#allocation5]  }
   0x8   :  { %s32_s23 = sshll.u32 %s1443_s22, 4  ;;  %s33_s23 = int_to_ptr.vmem [resolvable:$true] %s32_s23 }
   0x9   :  { %38 = dma.hbm_to_vmem [thread:$0]  %s31_s19, 1024, %s33_s23, [#allocation6], %s1441_s20, %s1441_s20, %s1442_s21  }
   0xa   :  { %1432 = dma.done.wait [#allocation3], 4096  }
   0xb   :  { %1433 = vsyncadd [#allocation3], 4294963200 }
   0xc   :  { %1434 = dma.done.wait [#allocation6], 1024  }
   0xd   :  { %1435 = vsyncadd [#allocation6], 4294966272  ;;  %v1112_v0 = vld [vmem:[#allocation5 + $0x38] sm:$0xff]  ;;  %v1111_v1 = vld [vmem:[#allocation5 + $0x30] sm:$0xff]  ;;  %s1444_s0 = smov [#allocation7]   ;;  %s881_s26 = sshll.u32 %s1785_s2, 4  ;;  %s882_s26 = int_to_ptr.hbm [resolvable:$true] %s881_s26 }
   0xe   :  { %367 = vmatpush.bf16.msra.mxu0 %v1112_v0  ;;  %1304 = vmatpush.bf16.msra.mxu1 %v1112_v0  ;;  %v1110_v2 = vld [vmem:[#allocation5 + $0x28] sm:$0xff]  ;;  %v1109_v3 = vld [vmem:[#allocation5 + $0x20] sm:$0xff]  ;;  %v1108_v4 = vld [vmem:[#allocation5 + $0x18] sm:$0xff]  ;;  %s879_s1 = sshll.u32 %s1444_s0, 4  ;;  %s1445_s2 = smov [#allocation8]   ;;  %s880_s1 = int_to_ptr.vmem [resolvable:$true] %s879_s1 }
   0xf   :  { %1305 = vmatpush.bf16.msra.mxu2 %v1112_v0  ;;  %1306 = vmatpush.bf16.msra.mxu3 %v1112_v0  ;;  %v1107_v5 = vld [vmem:[#allocation5 + $0x10] sm:$0xff]  ;;  %v1106_v6 = vld [vmem:[#allocation5 + $0x8] sm:$0xff]  ;;  %v1105_v7 = vld [vmem:[#allocation5] sm:$0xff]  ;;  %s892_s27 = sshll.u32 %s1445_s2, 4  ;;  %s894_s30 = sshll.u32 %s1786_s3, 4  ;;  %s893_s27 = int_to_ptr.vmem [resolvable:$true] %s892_s27  ;;  %s895_s30 = int_to_ptr.hbm [resolvable:$true] %s894_s30 }
  0x10   :  { %v1073_v8 = vld [vmem:[#allocation2] sm:$0xff]  ;;  %v1074_v10 = vld [vmem:[#allocation2 + $0x8] sm:$0xff]  ;;  %v1075_v13 = vld [vmem:[#allocation2 + $0x10] sm:$0xff]  ;;  %s1446_s4 = smov 128   ;;  %s1447_s5 = smov 8  }
  0x11   :  { %v1081_v9 = vld [vmem:[#allocation2 + $0x40] sm:$0xff]  ;;  %v1082_v11 = vld [vmem:[#allocation2 + $0x48] sm:$0xff]  ;;  %v1083_v14 = vld [vmem:[#allocation2 + $0x50] sm:$0xff] }
  0x12   :  { %368 = vmatpush.bf16.msra.mxu0 %v1111_v1  ;;  %1307 = vmatpush.bf16.msra.mxu1 %v1111_v1  ;;  %v1089_v12 = vld [vmem:[#allocation2 + $0x80] sm:$0xff]  ;;  %v1090_v15 = vld [vmem:[#allocation2 + $0x88] sm:$0xff]  ;;  %v1076_v16 = vld [vmem:[#allocation2 + $0x18] sm:$0xff] }
  0x13   :  { %1308 = vmatpush.bf16.msra.mxu2 %v1111_v1  ;;  %1309 = vmatpush.bf16.msra.mxu3 %v1111_v1  ;;  %v1084_v17 = vld [vmem:[#allocation2 + $0x58] sm:$0xff]  ;;  %v1091_v18 = vld [vmem:[#allocation2 + $0x90] sm:$0xff]  ;;  %v1097_v19 = vld [vmem:[#allocation2 + $0xc0] sm:$0xff] }
  0x14   :  { %v1077_v20 = vld [vmem:[#allocation2 + $0x20] sm:$0xff]  ;;  %v1092_v22 = vld [vmem:[#allocation2 + $0x98] sm:$0xff]  ;;  %v1098_v23 = vld [vmem:[#allocation2 + $0xc8] sm:$0xff] }
  0x15   :  { %v1085_v21 = vld [vmem:[#allocation2 + $0x60] sm:$0xff]  ;;  %v1078_v24 = vld [vmem:[#allocation2 + $0x28] sm:$0xff]  ;;  %v1099_v27 = vld [vmem:[#allocation2 + $0xd0] sm:$0xff] }
  0x16   :  { %369 = vmatpush.bf16.msra.mxu0 %v1110_v2  ;;  %1310 = vmatpush.bf16.msra.mxu1 %v1110_v2  ;;  %v1086_v25 = vld [vmem:[#allocation2 + $0x68] sm:$0xff]  ;;  %v1093_v26 = vld [vmem:[#allocation2 + $0xa0] sm:$0xff]  ;;  %v1079_v28 = vld [vmem:[#allocation2 + $0x30] sm:$0xff] }
  0x17   :  { %1311 = vmatpush.bf16.msra.mxu2 %v1110_v2  ;;  %1312 = vmatpush.bf16.msra.mxu3 %v1110_v2  ;;  %v1087_v29 = vld [vmem:[#allocation2 + $0x70] sm:$0xff]  ;;  %v1094_v30 = vld [vmem:[#allocation2 + $0xa8] sm:$0xff]  ;;  %v1100_v31 = vld [vmem:[#allocation2 + $0xd8] sm:$0xff] }
  0x18   :  { %v1080_v32 = vld [vmem:[#allocation2 + $0x38] sm:$0xff]  ;;  %v1095_v34 = vld [vmem:[#allocation2 + $0xb0] sm:$0xff]  ;;  %v1101_v35 = vld [vmem:[#allocation2 + $0xe0] sm:$0xff] }
  0x19   :  { %v1088_v33 = vld [vmem:[#allocation2 + $0x78] sm:$0xff]  ;;  %v1102_v39 = vld [vmem:[#allocation2 + $0xe8] sm:$0xff]  ;;  %v1103_v53 = vld [vmem:[#allocation2 + $0xf0] sm:$0xff] }
  0x1a   :  { %370 = vmatpush.bf16.msra.mxu0 %v1109_v3  ;;  %1313 = vmatpush.bf16.msra.mxu1 %v1109_v3  ;;  %v1096_v38 = vld [vmem:[#allocation2 + $0xb8] sm:$0xff] }
  0x1b   :  { %1314 = vmatpush.bf16.msra.mxu2 %v1109_v3  ;;  %1315 = vmatpush.bf16.msra.mxu3 %v1109_v3 }
  0x1e   :  { %371 = vmatpush.bf16.msra.mxu0 %v1108_v4  ;;  %1316 = vmatpush.bf16.msra.mxu1 %v1108_v4 }
  0x1f   :  { %1317 = vmatpush.bf16.msra.mxu2 %v1108_v4  ;;  %1318 = vmatpush.bf16.msra.mxu3 %v1108_v4 }
  0x22   :  { %372 = vmatpush.bf16.msra.mxu0 %v1107_v5  ;;  %1319 = vmatpush.bf16.msra.mxu1 %v1107_v5 }
  0x23   :  { %1320 = vmatpush.bf16.msra.mxu2 %v1107_v5  ;;  %1321 = vmatpush.bf16.msra.mxu3 %v1107_v5  ;;  %v1104_v5 = vld [vmem:[#allocation2 + $0xf8] sm:$0xff] }
  0x26   :  { %373 = vmatpush.bf16.msra.mxu0 %v1106_v6  ;;  %1322 = vmatpush.bf16.msra.mxu1 %v1106_v6 }
  0x27   :  { %1323 = vmatpush.bf16.msra.mxu2 %v1106_v6  ;;  %1324 = vmatpush.bf16.msra.mxu3 %v1106_v6 }
  0x2a   :  { %374 = vmatpush.bf16.msra.mxu0 %v1105_v7  ;;  %1325 = vmatpush.bf16.msra.mxu1 %v1105_v7 }
  0x2b   :  { %1326 = vmatpush.bf16.msra.mxu2 %v1105_v7  ;;  %1327 = vmatpush.bf16.msra.mxu3 %v1105_v7 }
  0x2d   :  { %375 = vmatmul.bf16.vlgmr.msra.gmra.mxu0 %v1073_v8  ;;  %415 = vmatmul.bf16.vlgmr.msra.gmra.mxu1 %v1081_v9 }
  0x2e   :  { %455 = vmatmul.bf16.vlgmr.msra.gmra.mxu2 %v1089_v12  ;;  %495 = vmatmul.bf16.vlgmr.msra.gmra.mxu3 %v1097_v19 }
  0x3d   :  { %380 = vmatmul.bf16.gmra.mxu0 %v1074_v10  ;;  %420 = vmatmul.bf16.gmra.mxu1 %v1082_v11 }
  0x3e   :  { %460 = vmatmul.bf16.gmra.mxu2 %v1090_v15  ;;  %500 = vmatmul.bf16.gmra.mxu3 %v1098_v23 }
  0x4d   :  { %385 = vmatmul.bf16.gmra.mxu0 %v1075_v13  ;;  %425 = vmatmul.bf16.gmra.mxu1 %v1083_v14 }
  0x4e   :  { %465 = vmatmul.bf16.gmra.mxu2 %v1091_v18  ;;  %505 = vmatmul.bf16.gmra.mxu3 %v1099_v27 }
  0x5d   :  { %390 = vmatmul.bf16.gmra.mxu0 %v1076_v16  ;;  %430 = vmatmul.bf16.gmra.mxu1 %v1084_v17 }
  0x5e   :  { %470 = vmatmul.bf16.gmra.mxu2 %v1092_v22  ;;  %510 = vmatmul.bf16.gmra.mxu3 %v1100_v31 }
  0x6d   :  { %395 = vmatmul.bf16.gmra.mxu0 %v1077_v20  ;;  %435 = vmatmul.bf16.gmra.mxu1 %v1085_v21 }
  0x6e   :  { %475 = vmatmul.bf16.gmra.mxu2 %v1093_v26  ;;  %515 = vmatmul.bf16.gmra.mxu3 %v1101_v35 }
  0x7d   :  { %400 = vmatmul.bf16.gmra.mxu0 %v1078_v24  ;;  %440 = vmatmul.bf16.gmra.mxu1 %v1086_v25 }
  0x7e   :  { %480 = vmatmul.bf16.gmra.mxu2 %v1094_v30  ;;  %520 = vmatmul.bf16.gmra.mxu3 %v1102_v39 }
  0x8d   :  { %405 = vmatmul.bf16.gmra.mxu0 %v1079_v28  ;;  %445 = vmatmul.bf16.gmra.mxu1 %v1087_v29 }
  0x8e   :  { %485 = vmatmul.bf16.gmra.mxu2 %v1095_v34  ;;  %525 = vmatmul.bf16.gmra.mxu3 %v1103_v53 }
  0x9d   :  { %410 = vmatmul.bf16.gmra.mxu0 %v1080_v32  ;;  %450 = vmatmul.bf16.gmra.mxu1 %v1088_v33 }
  0x9e   :  { %490 = vmatmul.bf16.gmra.mxu2 %v1096_v38  ;;  %530 = vmatmul.bf16.gmra.mxu3 %v1104_v5 }
  0xaa   :  { %v376_v36 = vpop.f32.mrf.mxu0  ;;  %v1480_v37 = vpop.f32.mrf.mxu1 }
  0xab   :  { %v733_v40 = vmul.f32 %v376_v36, %v376_v36 }
  0xb1   :  { %v1492_v60 = vpop.f32.mrf.mxu2  ;;  %v1522_v20 = vpop.f32.mrf.mxu3 }
  0xb2   :  { %v378_v41 = vpop.f32.mrf.mxu0  ;;  %v1482_v42 = vpop.f32.mrf.mxu1 }
  0xb3   :  { %v1116_v43 = vpack.c.bf16 %v378_v41, %v376_v36  ;;  %v664_v44 = vadd.f32 %v378_v41, %v376_v36  ;;  %v734_v45 = vmul.f32 %v378_v41, %v378_v41  ;;  %v1156_v46 = vpack.c.bf16 %v1482_v42, %v1480_v37 }
  0xb5   :  { %1117 = vst [vmem:[#allocation7] sm:$0xff] %v1116_v43   ;;  %v797_v47 = vadd.f32 %v734_v45, %v733_v40 }
  0xb6   :  { %1280 = vst [vmem:[#allocation7 + $0x40] sm:$0xff] %v1156_v46  }
  0xb9   :  { %v1498_v2 = vpop.f32.mrf.mxu2  ;;  %v1528_v24 = vpop.f32.mrf.mxu3 }
  0xba   :  { %v381_v48 = vpop.f32.mrf.mxu0  ;;  %v1486_v49 = vpop.f32.mrf.mxu1  ;;  %v1196_v3 = vpack.c.bf16 %v1498_v2, %v1492_v60  ;;  %v1236_v26 = vpack.c.bf16 %v1528_v24, %v1522_v20 }
  0xbb   :  { %v665_v50 = vadd.f32 %v664_v44, %v381_v48  ;;  %v735_v51 = vmul.f32 %v381_v48, %v381_v48 }
  0xbc   :  { %1288 = vst [vmem:[#allocation7 + $0x80] sm:$0xff] %v1196_v3  }
  0xbd   :  { %v798_v52 = vadd.f32 %v797_v47, %v735_v51  ;;  %1296 = vst [vmem:[#allocation7 + $0xc0] sm:$0xff] %v1236_v26  }
  0xc1   :  { %v1508_v10 = vpop.f32.mrf.mxu2  ;;  %v1540_v32 = vpop.f32.mrf.mxu3 }
  0xc2   :  { %v383_v54 = vpop.f32.mrf.mxu0  ;;  %v1488_v55 = vpop.f32.mrf.mxu1 }
  0xc3   :  { %v1121_v56 = vpack.c.bf16 %v383_v54, %v381_v48  ;;  %v666_v57 = vadd.f32 %v665_v50, %v383_v54  ;;  %v736_v58 = vmul.f32 %v383_v54, %v383_v54  ;;  %v1161_v59 = vpack.c.bf16 %v1488_v55, %v1486_v49 }
  0xc5   :  { %1273 = vst [vmem:[#allocation7 + $0x8] sm:$0xff] %v1121_v56   ;;  %v799_v61 = vadd.f32 %v798_v52, %v736_v58 }
  0xc6   :  { %1281 = vst [vmem:[#allocation7 + $0x48] sm:$0xff] %v1161_v59  }
  0xc9   :  { %v1512_v13 = vpop.f32.mrf.mxu2  ;;  %v1546_v36 = vpop.f32.mrf.mxu3 }
  0xca   :  { %v386_v62 = vpop.f32.mrf.mxu0  ;;  %v1494_v63 = vpop.f32.mrf.mxu1  ;;  %v1201_v14 = vpack.c.bf16 %v1512_v13, %v1508_v10  ;;  %v1241_v39 = vpack.c.bf16 %v1546_v36, %v1540_v32 }
  0xcb   :  { %v1496_v0 = vadd.f32 %v666_v57, %v386_v62  ;;  %v737_v1 = vmul.f32 %v386_v62, %v386_v62 }
  0xcc   :  { %1289 = vst [vmem:[#allocation7 + $0x88] sm:$0xff] %v1201_v14  }
  0xcd   :  { %v1502_v4 = vadd.f32 %v799_v61, %v737_v1  ;;  %1297 = vst [vmem:[#allocation7 + $0xc8] sm:$0xff] %v1241_v39  }
  0xd1   :  { %v1520_v19 = vpop.f32.mrf.mxu2  ;;  %v1558_v46 = vpop.f32.mrf.mxu3 }
  0xd2   :  { %v388_v6 = vpop.f32.mrf.mxu0  ;;  %v1504_v7 = vpop.f32.mrf.mxu1 }
  0xd3   :  { %v1126_v8 = vpack.c.bf16 %v388_v6, %v386_v62  ;;  %v1166_v9 = vpack.c.bf16 %v1504_v7, %v1494_v63  ;;  %v738_v52 = vmul.f32 %v388_v6, %v388_v6  ;;  %v668_v57 = vadd.f32 %v1496_v0, %v388_v6 }
  0xd5   :  { %1274 = vst [vmem:[#allocation7 + $0x10] sm:$0xff] %v1126_v8   ;;  %v801_v58 = vadd.f32 %v1502_v4, %v738_v52 }
  0xd6   :  { %1282 = vst [vmem:[#allocation7 + $0x50] sm:$0xff] %v1166_v9  }
  0xd9   :  { %v1526_v23 = vpop.f32.mrf.mxu2  ;;  %v1564_v51 = vpop.f32.mrf.mxu3 }
  0xda   :  { %v391_v11 = vpop.f32.mrf.mxu0  ;;  %v1510_v12 = vpop.f32.mrf.mxu1  ;;  %v1206_v25 = vpack.c.bf16 %v1526_v23, %v1520_v19  ;;  %v1246_v54 = vpack.c.bf16 %v1564_v51, %v1558_v46 }
  0xdb   :  { %v739_v56 = vmul.f32 %v391_v11, %v391_v11  ;;  %v669_v61 = vadd.f32 %v668_v57, %v391_v11 }
  0xdc   :  { %1290 = vst [vmem:[#allocation7 + $0x90] sm:$0xff] %v1206_v25  }
  0xdd   :  { %1298 = vst [vmem:[#allocation7 + $0xd0] sm:$0xff] %v1246_v54   ;;  %v802_v62 = vadd.f32 %v801_v58, %v739_v56 }
  0xe1   :  { %v1538_v31 = vpop.f32.mrf.mxu2 }
  0xe2   :  { %v393_v15 = vpop.f32.mrf.mxu0  ;;  %v1516_v16 = vpop.f32.mrf.mxu1 }
  0xe3   :  { %v1131_v17 = vpack.c.bf16 %v393_v15, %v391_v11  ;;  %v1171_v18 = vpack.c.bf16 %v1516_v16, %v1510_v12  ;;  %v740_v59 = vmul.f32 %v393_v15, %v393_v15  ;;  %v670_v8 = vadd.f32 %v669_v61, %v393_v15 }
  0xe5   :  { %1275 = vst [vmem:[#allocation7 + $0x18] sm:$0xff] %v1131_v17   ;;  %v803_v0 = vadd.f32 %v802_v62, %v740_v59 }
  0xe6   :  { %1283 = vst [vmem:[#allocation7 + $0x58] sm:$0xff] %v1171_v18   ;;  %v1578_v18 = vpop.f32.mrf.mxu3 }
  0xe9   :  { %v1544_v35 = vpop.f32.mrf.mxu2 }
  0xea   :  { %v396_v21 = vpop.f32.mrf.mxu0  ;;  %v1524_v22 = vpop.f32.mrf.mxu1  ;;  %v1211_v38 = vpack.c.bf16 %v1544_v35, %v1538_v31 }
  0xeb   :  { %v741_v1 = vmul.f32 %v396_v21, %v396_v21  ;;  %v671_v25 = vadd.f32 %v670_v8, %v396_v21 }
  0xec   :  { %1291 = vst [vmem:[#allocation7 + $0x98] sm:$0xff] %v1211_v38  }
  0xed   :  { %v804_v4 = vadd.f32 %v803_v0, %v741_v1 }
  0xee   :  { %v1584_v54 = vpop.f32.mrf.mxu3 }
  0xf1   :  { %v1556_v45 = vpop.f32.mrf.mxu2 }
  0xf2   :  { %v398_v27 = vpop.f32.mrf.mxu0  ;;  %v1534_v28 = vpop.f32.mrf.mxu1 }
  0xf3   :  { %v1136_v29 = vpack.c.bf16 %v398_v27, %v396_v21  ;;  %v1176_v30 = vpack.c.bf16 %v1534_v28, %v1524_v22  ;;  %v742_v6 = vmul.f32 %v398_v27, %v398_v27  ;;  %v672_v26 = vadd.f32 %v671_v25, %v398_v27 }
  0xf4   :  { %v1251_v27 = vpack.c.bf16 %v1584_v54, %v1578_v18 }
  0xf5   :  { %1276 = vst [vmem:[#allocation7 + $0x20] sm:$0xff] %v1136_v29   ;;  %v805_v29 = vadd.f32 %v804_v4, %v742_v6 }
  0xf6   :  { %1284 = vst [vmem:[#allocation7 + $0x60] sm:$0xff] %v1176_v30  }
  0xf7   :  { %1299 = vst [vmem:[#allocation7 + $0xd8] sm:$0xff] %v1251_v27  }
  0xf9   :  { %v1562_v50 = vpop.f32.mrf.mxu2 }
  0xfa   :  { %v401_v33 = vpop.f32.mrf.mxu0  ;;  %v1542_v34 = vpop.f32.mrf.mxu1  ;;  %v1216_v53 = vpack.c.bf16 %v1562_v50, %v1556_v45 }
  0xfb   :  { %v743_v11 = vmul.f32 %v401_v33, %v401_v33  ;;  %v673_v38 = vadd.f32 %v672_v26, %v401_v33 }
  0xfc   :  { %1292 = vst [vmem:[#allocation7 + $0xa0] sm:$0xff] %v1216_v53  }
  0xfd   :  { %v806_v15 = vadd.f32 %v805_v29, %v743_v11  ;;  %v750_v29 = vmul.f32 %v1482_v42, %v1482_v42 }
 0x101   :  { %v1576_v17 = vpop.f32.mrf.mxu2 }
 0x102   :  { %v403_v40 = vpop.f32.mrf.mxu0  ;;  %v1552_v41 = vpop.f32.mrf.mxu1 }
 0x103   :  { %v1141_v43 = vpack.c.bf16 %v403_v40, %v401_v33  ;;  %v1181_v44 = vpack.c.bf16 %v1552_v41, %v1542_v34  ;;  %v744_v30 = vmul.f32 %v403_v40, %v403_v40  ;;  %v674_v52 = vadd.f32 %v673_v38, %v403_v40 }
 0x105   :  { %1277 = vst [vmem:[#allocation7 + $0x28] sm:$0xff] %v1141_v43   ;;  %v807_v56 = vadd.f32 %v806_v15, %v744_v30  ;;  %v751_v15 = vmul.f32 %v1486_v49, %v1486_v49 }
 0x106   :  { %1285 = vst [vmem:[#allocation7 + $0x68] sm:$0xff] %v1181_v44  }
 0x109   :  { %v1582_v53 = vpop.f32.mrf.mxu2 }
 0x10a   :  { %v406_v47 = vpop.f32.mrf.mxu0  ;;  %v1560_v48 = vpop.f32.mrf.mxu1  ;;  %v1221_v57 = vpack.c.bf16 %v1582_v53, %v1576_v17 }
 0x10b   :  { %v745_v39 = vmul.f32 %v406_v47, %v406_v47  ;;  %v675_v58 = vadd.f32 %v674_v52, %v406_v47  ;;  %v752_v52 = vmul.f32 %v1488_v55, %v1488_v55 }
 0x10c   :  { %1293 = vst [vmem:[#allocation7 + $0xa8] sm:$0xff] %v1221_v57  }
 0x10d   :  { %v808_v33 = vadd.f32 %v807_v56, %v745_v39 }
 0x111   :  { %v1594_v4 = vpop.f32.mrf.mxu2 }
 0x112   :  { %v408_v3 = vpop.f32.mrf.mxu0  ;;  %v1572_v5 = vpop.f32.mrf.mxu1 }
 0x113   :  { %v1146_v9 = vpack.c.bf16 %v408_v3, %v406_v47  ;;  %v1186_v14 = vpack.c.bf16 %v1572_v5, %v1560_v48  ;;  %v746_v21 = vmul.f32 %v408_v3, %v408_v3  ;;  %v676_v61 = vadd.f32 %v675_v58, %v408_v3  ;;  %v1596_v47 = vpop.f32.mrf.mxu3 }
 0x114   :  { %v749_v3 = vmul.f32 %v1480_v37, %v1480_v37 }
 0x115   :  { %1278 = vst [vmem:[#allocation7 + $0x30] sm:$0xff] %v1146_v9   ;;  %v809_v62 = vadd.f32 %v808_v33, %v746_v21 }
 0x116   :  { %1286 = vst [vmem:[#allocation7 + $0x70] sm:$0xff] %v1186_v14  }
 0x119   :  { %v1610_v21 = vpop.f32.mrf.mxu2 }
 0x11a   :  { %v411_v43 = vpop.f32.mrf.mxu0  ;;  %v1580_v44 = vpop.f32.mrf.mxu1 }
 0x11b   :  { %v747_v59 = vmul.f32 %v411_v43, %v411_v43  ;;  %v677_v40 = vadd.f32 %v676_v61, %v411_v43  ;;  %v1612_v57 = vpop.f32.mrf.mxu3 }
 0x11c   :  { %v1256_v27 = vpack.c.bf16 %v1612_v57, %v1596_v47 }
 0x11d   :  { %v810_v1 = vadd.f32 %v809_v62, %v747_v59  ;;  %v755_v62 = vmul.f32 %v1510_v12, %v1510_v12 }
 0x11e   :  { %1300 = vst [vmem:[#allocation7 + $0xe0] sm:$0xff] %v1256_v27   ;;  %v762_v27 = vmul.f32 %v1572_v5, %v1572_v5 }
 0x122   :  { %v413_v8 = vpop.f32.mrf.mxu0  ;;  %v1590_v9 = vpop.f32.mrf.mxu1 }
 0x123   :  { %v1151_v14 = vpack.c.bf16 %v413_v8, %v411_v43  ;;  %v678_v0 = vadd.f32 %v677_v40, %v413_v8  ;;  %v748_v6 = vmul.f32 %v413_v8, %v413_v8  ;;  %v1191_v25 = vpack.c.bf16 %v1590_v9, %v1580_v44 }
 0x124   :  { %v756_v8 = vmul.f32 %v1516_v16, %v1516_v16 }
 0x125   :  { %1279 = vst [vmem:[#allocation7 + $0x38] sm:$0xff] %v1151_v14   ;;  %v679_v11 = vadd.f32 %v678_v0, %v1480_v37  ;;  %v811_v26 = vadd.f32 %v810_v1, %v748_v6  ;;  %v1630_v0 = vpop.f32.mrf.mxu2  ;;  %v1632_v6 = vpop.f32.mrf.mxu3 }
 0x126   :  { %1287 = vst [vmem:[#allocation7 + $0x78] sm:$0xff] %v1191_v25  }
 0x127   :  { %v680_v30 = vadd.f32 %v679_v11, %v1482_v42  ;;  %v812_v38 = vadd.f32 %v811_v26, %v749_v3  ;;  %v1226_v42 = vpack.c.bf16 %v1610_v21, %v1594_v4  ;;  %v758_v11 = vmul.f32 %v1534_v28, %v1534_v28 }
 0x129   :  { %v681_v39 = vadd.f32 %v680_v30, %v1486_v49  ;;  %v813_v43 = vadd.f32 %v812_v38, %v750_v29  ;;  %v753_v49 = vmul.f32 %v1494_v63, %v1494_v63  ;;  %1294 = vst [vmem:[#allocation7 + $0xb0] sm:$0xff] %v1226_v42   ;;  %v760_v38 = vmul.f32 %v1552_v41, %v1552_v41 }
 0x12b   :  { %v682_v56 = vadd.f32 %v681_v39, %v1488_v55  ;;  %v814_v37 = vadd.f32 %v813_v43, %v751_v15  ;;  %v754_v55 = vmul.f32 %v1504_v7, %v1504_v7 }
 0x12d   :  { %v683_v58 = vadd.f32 %v682_v56, %v1494_v63  ;;  %v815_v33 = vadd.f32 %v814_v37, %v752_v52  ;;  %v1648_v43 = vpop.f32.mrf.mxu3 }
 0x12e   :  { %v1261_v52 = vpack.c.bf16 %v1648_v43, %v1632_v6 }
 0x12f   :  { %v684_v59 = vadd.f32 %v683_v58, %v1504_v7  ;;  %v816_v61 = vadd.f32 %v815_v33, %v753_v49  ;;  %v757_v7 = vmul.f32 %v1524_v22, %v1524_v22  ;;  %v763_v33 = vmul.f32 %v1580_v44, %v1580_v44 }
 0x130   :  { %1301 = vst [vmem:[#allocation7 + $0xe8] sm:$0xff] %v1261_v52   ;;  %v773_v52 = vmul.f32 %v1556_v45, %v1556_v45 }
 0x131   :  { %v817_v40 = vadd.f32 %v816_v61, %v754_v55  ;;  %v685_v1 = vadd.f32 %v684_v59, %v1510_v12 }
 0x133   :  { %v686_v63 = vadd.f32 %v685_v1, %v1516_v16  ;;  %v818_v14 = vadd.f32 %v817_v40, %v755_v62  ;;  %v759_v16 = vmul.f32 %v1542_v34, %v1542_v34  ;;  %v765_v62 = vmul.f32 %v1492_v60, %v1492_v60 }
 0x134   :  { %v766_v1 = vmul.f32 %v1498_v2, %v1498_v2 }
 0x135   :  { %v687_v25 = vadd.f32 %v686_v63, %v1524_v22  ;;  %v819_v3 = vadd.f32 %v818_v14, %v756_v8  ;;  %v1646_v22 = vpop.f32.mrf.mxu2  ;;  %v1666_v61 = vpop.f32.mrf.mxu3  ;;  %v767_v63 = vmul.f32 %v1508_v10, %v1508_v10 }
 0x137   :  { %v688_v12 = vadd.f32 %v687_v25, %v1534_v28  ;;  %v820_v26 = vadd.f32 %v819_v3, %v757_v7  ;;  %v1231_v28 = vpack.c.bf16 %v1646_v22, %v1630_v0  ;;  %v768_v7 = vmul.f32 %v1512_v13, %v1512_v13 }
 0x139   :  { %v689_v29 = vadd.f32 %v688_v12, %v1542_v34  ;;  %v821_v30 = vadd.f32 %v820_v26, %v758_v11  ;;  %v761_v34 = vmul.f32 %v1560_v48, %v1560_v48  ;;  %1295 = vst [vmem:[#allocation7 + $0xb8] sm:$0xff] %v1231_v28  }
 0x13b   :  { %v690_v15 = vadd.f32 %v689_v29, %v1552_v41  ;;  %v822_v39 = vadd.f32 %v821_v30, %v759_v16 }
 0x13d   :  { %v691_v56 = vadd.f32 %v690_v15, %v1560_v48  ;;  %v823_v37 = vadd.f32 %v822_v39, %v760_v38  ;;  %v764_v48 = vmul.f32 %v1590_v9, %v1590_v9  ;;  %v772_v15 = vmul.f32 %v1544_v35, %v1544_v35 }
 0x13f   :  { %v824_v42 = vadd.f32 %v823_v37, %v761_v34  ;;  %v692_v41 = vadd.f32 %v691_v56, %v1572_v5  ;;  %v774_v34 = vmul.f32 %v1562_v50, %v1562_v50 }
 0x141   :  { %v825_v49 = vadd.f32 %v824_v42, %v762_v27  ;;  %v693_v58 = vadd.f32 %v692_v41, %v1580_v44  ;;  %v775_v42 = vmul.f32 %v1576_v17, %v1576_v17  ;;  %v776_v27 = vmul.f32 %v1582_v53, %v1582_v53 }
 0x143   :  { %v826_v55 = vadd.f32 %v825_v49, %v763_v33  ;;  %v694_v59 = vadd.f32 %v693_v58, %v1590_v9 }
 0x145   :  { %v695_v5 = vadd.f32 %v694_v59, %v1492_v60  ;;  %v827_v40 = vadd.f32 %v826_v55, %v764_v48  ;;  %v1680_v60 = vpop.f32.mrf.mxu3  ;;  %v777_v55 = vmul.f32 %v1594_v4, %v1594_v4 }
 0x146   :  { %v1266_v11 = vpack.c.bf16 %v1680_v60, %v1666_v61 }
 0x147   :  { %v696_v8 = vadd.f32 %v695_v5, %v1498_v2  ;;  %v828_v44 = vadd.f32 %v827_v40, %v765_v62  ;;  %v769_v2 = vmul.f32 %v1520_v19, %v1520_v19  ;;  %v779_v40 = vmul.f32 %v1630_v0, %v1630_v0 }
 0x148   :  { %1302 = vst [vmem:[#allocation7 + $0xf0] sm:$0xff] %v1266_v11  }
 0x149   :  { %v697_v14 = vadd.f32 %v696_v8, %v1508_v10  ;;  %v829_v9 = vadd.f32 %v828_v44, %v766_v1  ;;  %v770_v10 = vmul.f32 %v1526_v23, %v1526_v23  ;;  %v780_v8 = vmul.f32 %v1646_v22, %v1646_v22 }
 0x14a   :  { %v781_v44 = vmul.f32 %v1522_v20, %v1522_v20 }
 0x14b   :  { %v698_v25 = vadd.f32 %v697_v14, %v1512_v13  ;;  %v830_v3 = vadd.f32 %v829_v9, %v767_v63  ;;  %v771_v13 = vmul.f32 %v1538_v31, %v1538_v31  ;;  %v782_v14 = vmul.f32 %v1528_v24, %v1528_v24 }
 0x14d   :  { %v699_v12 = vadd.f32 %v698_v25, %v1520_v19  ;;  %v831_v26 = vadd.f32 %v830_v3, %v768_v7  ;;  %v1696_v28 = vpop.f32.mrf.mxu3 }
 0x14f   :  { %v700_v16 = vadd.f32 %v699_v12, %v1526_v23  ;;  %v832_v29 = vadd.f32 %v831_v26, %v769_v2 }
 0x151   :  { %v833_v30 = vadd.f32 %v832_v29, %v770_v10  ;;  %v701_v38 = vadd.f32 %v700_v16, %v1538_v31 }
 0x153   :  { %v702_v39 = vadd.f32 %v701_v38, %v1544_v35  ;;  %v834_v19 = vadd.f32 %v833_v30, %v771_v13 }
 0x155   :  { %v703_v23 = vadd.f32 %v702_v39, %v1556_v45  ;;  %v835_v56 = vadd.f32 %v834_v19, %v772_v15 }
 0x157   :  { %v704_v37 = vadd.f32 %v703_v23, %v1562_v50  ;;  %v836_v31 = vadd.f32 %v835_v56, %v773_v52  ;;  %v1713_v50 = vpop.f32.mrf.mxu3 }
 0x158   :  { %v1271_v58 = vpack.c.bf16 %v1713_v50, %v1696_v28 }
 0x159   :  { %v705_v35 = vadd.f32 %v704_v37, %v1576_v17  ;;  %v837_v41 = vadd.f32 %v836_v31, %v774_v34  ;;  %v792_v34 = vmul.f32 %v1648_v43, %v1648_v43 }
 0x15a   :  { %1303 = vst [vmem:[#allocation7 + $0xf8] sm:$0xff] %v1271_v58   ;;  %v796_v58 = vmul.f32 %v1713_v50, %v1713_v50 }
 0x15b   :  { %v706_v45 = vadd.f32 %v705_v35, %v1582_v53  ;;  %v838_v49 = vadd.f32 %v837_v41, %v775_v42  ;;  %v778_v53 = vmul.f32 %v1610_v21, %v1610_v21  ;;  %887 = dma.vmem_to_hbm [thread:$0]  %s880_s1, 4096, %s882_s26, [#allocation4], %s1441_s20, %s1441_s20, %s1442_s21   ;;  %v793_v42 = vmul.f32 %v1666_v61, %v1666_v61 }
 0x15c   :  { %v794_v41 = vmul.f32 %v1680_v60, %v1680_v60 }
 0x15d   :  { %v839_v17 = vadd.f32 %v838_v49, %v776_v27  ;;  %v707_v33 = vadd.f32 %v706_v45, %v1594_v4  ;;  %v795_v27 = vmul.f32 %v1696_v28, %v1696_v28 }
 0x15f   :  { %v840_v59 = vadd.f32 %v839_v17, %v777_v55  ;;  %v708_v48 = vadd.f32 %v707_v33, %v1610_v21 }
 0x161   :  { %v841_v62 = vadd.f32 %v840_v59, %v778_v53  ;;  %v709_v5 = vadd.f32 %v708_v48, %v1630_v0  ;;  %v783_v0 = vmul.f32 %v1540_v32, %v1540_v32 }
 0x163   :  { %v842_v1 = vadd.f32 %v841_v62, %v779_v40  ;;  %v710_v4 = vadd.f32 %v709_v5, %v1646_v22  ;;  %v784_v22 = vmul.f32 %v1546_v36, %v1546_v36 }
 0x165   :  { %v711_v21 = vadd.f32 %v710_v4, %v1522_v20  ;;  %v843_v63 = vadd.f32 %v842_v1, %v780_v8  ;;  %v785_v20 = vmul.f32 %v1558_v46, %v1558_v46 }
 0x167   :  { %v712_v9 = vadd.f32 %v711_v21, %v1528_v24  ;;  %v844_v7 = vadd.f32 %v843_v63, %v781_v44  ;;  %v786_v24 = vmul.f32 %v1564_v51, %v1564_v51 }
 0x169   :  { %v713_v25 = vadd.f32 %v712_v9, %v1540_v32  ;;  %v845_v3 = vadd.f32 %v844_v7, %v782_v14  ;;  %v787_v32 = vmul.f32 %v1578_v18, %v1578_v18 }
 0x16b   :  { %v714_v11 = vadd.f32 %v713_v25, %v1546_v36  ;;  %v846_v2 = vadd.f32 %v845_v3, %v783_v0  ;;  %v788_v36 = vmul.f32 %v1584_v54, %v1584_v54 }
 0x16d   :  { %v715_v12 = vadd.f32 %v714_v11, %v1558_v46  ;;  %v847_v26 = vadd.f32 %v846_v2, %v784_v22  ;;  %v789_v46 = vmul.f32 %v1596_v47, %v1596_v47 }
 0x16f   :  { %v716_v10 = vadd.f32 %v715_v12, %v1564_v51  ;;  %v848_v16 = vadd.f32 %v847_v26, %v785_v20  ;;  %v790_v51 = vmul.f32 %v1612_v57, %v1612_v57 }
 0x171   :  { %v849_v29 = vadd.f32 %v848_v16, %v786_v24  ;;  %v717_v13 = vadd.f32 %v716_v10, %v1578_v18  ;;  %v791_v18 = vmul.f32 %v1632_v6, %v1632_v6 }
 0x173   :  { %v718_v30 = vadd.f32 %v717_v13, %v1584_v54  ;;  %v850_v38 = vadd.f32 %v849_v29, %v787_v32 }
 0x175   :  { %v719_v15 = vadd.f32 %v718_v30, %v1596_v47  ;;  %v851_v39 = vadd.f32 %v850_v38, %v788_v36 }
 0x177   :  { %v720_v19 = vadd.f32 %v719_v15, %v1612_v57  ;;  %v852_v52 = vadd.f32 %v851_v39, %v789_v46 }
 0x179   :  { %v721_v23 = vadd.f32 %v720_v19, %v1632_v6  ;;  %v853_v56 = vadd.f32 %v852_v52, %v790_v51 }
 0x17b   :  { %v722_v54 = vadd.f32 %v721_v23, %v1648_v43  ;;  %v854_v37 = vadd.f32 %v853_v56, %v791_v18 }
 0x17d   :  { %v855_v47 = vadd.f32 %v854_v37, %v792_v34  ;;  %v723_v31 = vadd.f32 %v722_v54, %v1666_v61 }
 0x17f   :  { %v856_v57 = vadd.f32 %v855_v47, %v793_v42  ;;  %v724_v35 = vadd.f32 %v723_v31, %v1680_v60 }
 0x181   :  { %v857_v6 = vadd.f32 %v856_v57, %v794_v41  ;;  %v725_v45 = vadd.f32 %v724_v35, %v1696_v28 }
 0x183   :  { %v858_v43 = vadd.f32 %v857_v6, %v795_v27  ;;  %v726_v49 = vadd.f32 %v725_v45, %v1713_v50 }
 0x185   :  { %v727_v17 = vrot.slane %v726_v49, 4  ;;  %v859_v61 = vadd.f32 %v858_v43, %v796_v58 }
 0x187   :  { %v728_v33 = vadd.f32 %v727_v17, %v726_v49  ;;  %v860_v55 = vrot.slane %v859_v61, 4 }
 0x189   :  { %v729_v59 = vrot.slane %v728_v33, 2  ;;  %v861_v48 = vadd.f32 %v860_v55, %v859_v61 }
 0x18b   :  { %v730_v53 = vadd.f32 %v729_v59, %v728_v33  ;;  %v862_v60 = vrot.slane %v861_v48, 2 }
 0x18d   :  { %v731_v62 = vrot.slane %v730_v53, 1  ;;  %v863_v5 = vadd.f32 %v862_v60, %v861_v48 }
 0x18f   :  { %v732_v28 = vadd.f32 %v731_v62, %v730_v53  ;;  %v864_v40 = vrot.slane %v863_v5, 1 }
 0x191   :  { %v865_v50 = vadd.f32 %v864_v40, %v863_v5  ;;  %873 = vst [vmem:[#allocation8] sm:$0xff] %v732_v28 }
 0x193   :  { %874 = vst [vmem:[#allocation8 + $0x8] sm:$0xff] %v865_v50 }
 0x194   :  { %900 = dma.vmem_to_hbm [thread:$0]  %s893_s27, 256, %s895_s30, [#allocation9], %s1446_s4, %s1446_s4, %s1447_s5  }
 0x195   :  { %1436 = dma.done.wait [#allocation4], 4096  }
 0x196   :  { %1437 = vsyncadd [#allocation4], 4294963200 }
 0x197   :  { %1438 = dma.done.wait [#allocation9], 256  }
 0x198   :  { %1439 = vsyncadd [#allocation9], 4294967040 }
 0x199   :  { %909 = vsyncpa [#allocation3], 1 }
 0x19a   :  { %910 = vsyncpa [#allocation6], 1 }
 0x19b   :  { %911 = vsyncpa [#allocation4], 1 }
 0x19c   :  { %912 = vsyncpa [#allocation9], 1 }

</bundles_post_ra>
